<compile_context>
chip_gen: v7x
topology: tpu7x:2x2x1
jax: 0.10.0
libtpu: 0.0.40
codegen_flags: <defaults>
</compile_context>

<pallas_src>
import jax
import jax.numpy as jnp
from jax.experimental import pallas as pl
from jax.experimental.pallas import tpu as pltpu

X_SIZE = 32                               # stand-in for data.x_size
WIDTHS = [64, 32, 16, 8, 4, 2]            # step_1 block output widths
LAYER_DIMS = list(zip([X_SIZE] + WIDTHS[:-1], WIDTHS))
LEAKY_SLOPE = 0.01                        # nn.LeakyReLU() default
BN_EPS = 1e-5                             # nn.BatchNorm1d default

# First MXU_LAYERS matmuls run on the MXU; the out_dim<=8 tail layers run as
# VPU broadcast-multiply-adds.  Per review: worth a one-constant sweep per
# chip generation (v5e crossover differs: 3 XLUs, cheap 128x128 MXU pass).
MXU_LAYERS = 3
# bf16 MXU inputs with f32 accumulation; set to jnp.float32 for bit-closer
# parity runs against true f32 PyTorch matmuls.
MXU_INPUT_DTYPE = jnp.bfloat16

# ---- single packed-parameter slab (all weights stored (in, out), lane 0) ----
SLAB_LANES = 64                           # widest layer output
_offs, _r = [], 0
for _din, _dout in LAYER_DIMS:
    _offs.append(_r)
    _r += _din
W_ROW_OFFSETS = _offs
W7_ROW = _r                               # final Linear(2,1) weight rows
_r += 2
GAMMA_ROW = _r                            # 6 gamma rows
_r += 6
BETA_ROW = _r                             # 6 beta rows
_r += 6
B7_ROW = _r                               # final bias, lane 0
_r += 1
P_SLAB_ROWS = ((_r + 7) // 8) * 8         # 176
OUT_LANES = 128                           # lane-dense merged output block


def _tree_sum(terms):
    """Pairwise-tree sum: keeps the VPU accumulate chain log-depth."""
    while len(terms) > 1:
        nxt = [terms[i] + terms[i + 1] for i in range(0, len(terms) - 1, 2)]
        if len(terms) % 2:
            nxt.append(terms[-1])
        terms = nxt
    return terms[0]


def _mlp_kernel(x_ref, p_ref, out_ref):
    """Fused forward pass: 2 input DMAs, 1 unmasked output store, no grid."""
    B = x_ref.shape[0]
    inv_b = 1.0 / B

    h = x_ref[...]                         # bf16 (pre-cast in wrapper)

    for li, (din, dout) in enumerate(LAYER_DIMS):
        r0 = W_ROW_OFFSETS[li]

        if li < MXU_LAYERS:
            # In-kernel weight cast kept (merging the slabs / dropping a DMA
            # outranks the ~8-vreg pack it costs; x itself is pre-cast).
            w = p_ref[r0:r0 + din, 0:dout].astype(MXU_INPUT_DTYPE)
            y = jnp.dot(h.astype(MXU_INPUT_DTYPE), w,
                        preferred_element_type=jnp.float32)
        else:
            # Tail layer on the VPU: y = sum_k h[:, k] * W[k, :]
            terms = [h[:, k:k + 1] * p_ref[r0 + k:r0 + k + 1, 0:dout]
                     for k in range(din)]
            y = _tree_sum(terms)

        # BatchNorm1d, train mode (biased batch statistics), centered form
        # to avoid E[y^2]-mean^2 cancellation; affine folded into scale/add.
        mean = jnp.sum(y, axis=0, keepdims=True) * inv_b
        d = y - mean
        var = jnp.sum(d * d, axis=0, keepdims=True) * inv_b
        gamma = p_ref[GAMMA_ROW + li:GAMMA_ROW + li + 1, 0:dout]
        beta = p_ref[BETA_ROW + li:BETA_ROW + li + 1, 0:dout]
        scale = gamma * jax.lax.rsqrt(var + BN_EPS)      # (1, dout)
        y_aff = d * scale + beta
        # LeakyReLU(0.01) as a single max (slope < 1).
        h = jnp.maximum(y_aff, LEAKY_SLOPE * y_aff)

    # step_2: Linear(2, 1) + bias, Sigmoid (VPU + EUP, no MXU round-trip).
    b7 = p_ref[B7_ROW:B7_ROW + 1, 0:1]
    logit = (h[:, 0:1] * p_ref[W7_ROW:W7_ROW + 1, 0:1]
             + h[:, 1:2] * p_ref[W7_ROW + 1:W7_ROW + 2, 0:1]
             + b7)
    # Reciprocal on the EUP slot (exp already lives there).
    prob = pl.reciprocal(1.0 + jnp.exp(-logit), approx=True)

    # Single unmasked full-width store: lanes 0-1 = hidden_output, lane 2 = prob,
    # lanes 3-127 explicit zeros (no stale VMEM, no masked vst.msk stores).
    pad = jnp.zeros((B, OUT_LANES - 3), jnp.float32)
    out_ref[...] = jnp.concatenate([h, prob, pad], axis=1)


@jax.jit
def classifier_forward(x, p_slab):
    """Returns (sigmoid output (B,1), hidden_output (B,2))."""
    B = x.shape[0]
    vmem = pl.BlockSpec(memory_space=pltpu.MemorySpace.VMEM)
    slab = pl.pallas_call(
        _mlp_kernel,
        out_shape=jax.ShapeDtypeStruct((B, OUT_LANES), jnp.float32),
        in_specs=[vmem, vmem],
        out_specs=vmem,
    )(x.astype(MXU_INPUT_DTYPE), p_slab)
    # TODO(synk): for large B (esp. v7x: 64 MiB VMEM, 2 TCs) tile the batch with
    # a ("parallel",) grid + two-pass global BN statistics (per-tile sum/sumsq
    # combined via a small second pass), shrink the output to (tile,8)/bf16,
    # and set pltpu.CompilerParams(vmem_limit_bytes=...); unnecessary at this B.
    return slab[:, 2:3], slab[:, 0:2]


def make_params(key):
    """Deterministic synthetic parameters (PyTorch-equivalent shapes/init)."""
    params = []
    for din, dout in LAYER_DIMS:
        key, kw = jax.random.split(key)
        # PyTorch Linear weight is (out, in); we keep (in, out) for h @ W.
        w = jax.random.normal(kw, (din, dout), jnp.float32) / jnp.sqrt(float(din))
        gamma = jnp.ones((dout,), jnp.float32)    # BatchNorm1d.weight init
        beta = jnp.zeros((dout,), jnp.float32)    # BatchNorm1d.bias init
        params.append((w, gamma, beta))
    key, kw, kb = jax.random.split(key, 3)
    w7 = jax.random.normal(kw, (2, 1), jnp.float32) / jnp.sqrt(2.0)
    b7 = jax.random.normal(kb, (), jnp.float32) * 0.1
    params.append((w7, b7))
    return params


def pack_params(params):
    """Pack all 20 tiny parameter tensors into ONE lane-dense f32 VMEM slab."""
    p_slab = jnp.zeros((P_SLAB_ROWS, SLAB_LANES), jnp.float32)
    for li, (din, dout) in enumerate(LAYER_DIMS):
        w, gamma, beta = params[li]
        r0 = W_ROW_OFFSETS[li]
        p_slab = p_slab.at[r0:r0 + din, 0:dout].set(w)
        p_slab = p_slab.at[GAMMA_ROW + li, 0:dout].set(gamma)
        p_slab = p_slab.at[BETA_ROW + li, 0:dout].set(beta)
    w7, b7 = params[-1]
    p_slab = p_slab.at[W7_ROW:W7_ROW + 2, 0:1].set(w7)
    p_slab = p_slab.at[B7_ROW, 0].set(b7)
    return p_slab


def reference_forward(x, params):
    """Pure-JAX reference mirroring the PyTorch train-mode forward.

    Note: mirrors the kernel's bf16 MXU inputs for the wide layers; set
    MXU_INPUT_DTYPE = jnp.float32 for a strict f32 parity run.
    """
    h = x
    for li, (din, dout) in enumerate(LAYER_DIMS):
        w, gamma, beta = params[li]
        if li < MXU_LAYERS:
            y = jnp.dot(h.astype(MXU_INPUT_DTYPE), w.astype(MXU_INPUT_DTYPE),
                        preferred_element_type=jnp.float32)
        else:
            y = jnp.dot(h, w, preferred_element_type=jnp.float32)
        mean = jnp.mean(y, axis=0, keepdims=True)
        var = jnp.mean((y - mean) ** 2, axis=0, keepdims=True)
        y = (y - mean) * jax.lax.rsqrt(var + BN_EPS) * gamma + beta
        h = jnp.where(y >= 0, y, LEAKY_SLOPE * y)
    w7, b7 = params[-1]
    logit = jnp.dot(h, w7, preferred_element_type=jnp.float32) + b7
    return jax.nn.sigmoid(logit), h


if __name__ == "__main__":
    key = jax.random.PRNGKey(0)
    key, kx, kp = jax.random.split(key, 3)

    B = 8
    x = jax.random.normal(kx, (B, X_SIZE), jnp.float32)
    params = make_params(kp)
    p_slab = pack_params(params)

    out, hidden = classifier_forward(x, p_slab)
    jax.block_until_ready((out, hidden))

    out_ref, hidden_ref = reference_forward(x, params)

    assert out.shape == (B, 1) and hidden.shape == (B, 2)
    assert bool(jnp.all(jnp.isfinite(out))) and bool(jnp.all(jnp.isfinite(hidden)))
    assert bool(jnp.all((out >= 0.0) & (out <= 1.0)))
    assert float(jnp.max(jnp.abs(out - out_ref))) < 5e-2
    assert float(jnp.max(jnp.abs(hidden - hidden_ref))) < 5e-2
    print("KERNEL_OK")
</pallas_src>

<mosaic_0001>
module attributes {stable_mosaic.version = 11 : i64} {
  func.func @_mlp_kernel(%arg0: memref<8x32xbf16, #tpu.memory_space<vmem>>, %arg1: memref<176x64xf32, #tpu.memory_space<vmem>>, %arg2: memref<8x128xf32, #tpu.memory_space<vmem>>) attributes {dimension_semantics = [], scalar_prefetch = 0 : i64, scratch_operands = 0 : i64, tpu.core_type = #tpu.core_type<tc>} {
    %c0 = arith.constant 0 : index
    %c0_0 = arith.constant 0 : index
    %0 = vector.load %arg0[%c0, %c0_0] : memref<8x32xbf16, #tpu.memory_space<vmem>>, vector<8x32xbf16>
    %c0_1 = arith.constant 0 : index
    %c0_2 = arith.constant 0 : index
    %1 = vector.load %arg1[%c0_1, %c0_2] : memref<176x64xf32, #tpu.memory_space<vmem>>, vector<32x64xf32>
    %2 = arith.truncf %1 : vector<32x64xf32> to vector<32x64xbf16>
    %cst = arith.constant dense<0.000000e+00> : vector<8x64xf32>
    %3 = tpu.matmul %0, %2, %cst {dimension_numbers = #tpu.dot_dimension_numbers<[1], [0], [0], [1], [0, 0, 1, 1], [], []>} : vector<8x32xbf16>, vector<32x64xbf16>, vector<8x64xf32> -> vector<8x64xf32>
    %cst_3 = arith.constant dense<0.000000e+00> : vector<64xf32>
    %4 = vector.multi_reduction <add>, %3, %cst_3 [0] : vector<8x64xf32> to vector<64xf32>
    %5 = vector.shape_cast %4 : vector<64xf32> to vector<1x64xf32>
    %cst_4 = arith.constant 1.250000e-01 : f32
    %6 = vector.broadcast %cst_4 : f32 to vector<1x64xf32>
    %7 = arith.mulf %5, %6 : vector<1x64xf32>
    %8 = vector.broadcast %7 : vector<1x64xf32> to vector<8x64xf32>
    %9 = arith.subf %3, %8 : vector<8x64xf32>
    %10 = arith.mulf %9, %9 : vector<8x64xf32>
    %cst_5 = arith.constant dense<0.000000e+00> : vector<64xf32>
    %11 = vector.multi_reduction <add>, %10, %cst_5 [0] : vector<8x64xf32> to vector<64xf32>
    %12 = vector.shape_cast %11 : vector<64xf32> to vector<1x64xf32>
    %cst_6 = arith.constant 1.250000e-01 : f32
    %13 = vector.broadcast %cst_6 : f32 to vector<1x64xf32>
    %14 = arith.mulf %12, %13 : vector<1x64xf32>
    %c158 = arith.constant 158 : index
    %c0_7 = arith.constant 0 : index
    %15 = vector.load %arg1[%c158, %c0_7] : memref<176x64xf32, #tpu.memory_space<vmem>>, vector<1x64xf32>
    %c164 = arith.constant 164 : index
    %c0_8 = arith.constant 0 : index
    %16 = vector.load %arg1[%c164, %c0_8] : memref<176x64xf32, #tpu.memory_space<vmem>>, vector<1x64xf32>
    %cst_9 = arith.constant 9.99999974E-6 : f32
    %17 = vector.broadcast %cst_9 : f32 to vector<1x64xf32>
    %18 = arith.addf %14, %17 : vector<1x64xf32>
    %19 = math.rsqrt %18 : vector<1x64xf32>
    %20 = arith.mulf %15, %19 : vector<1x64xf32>
    %21 = vector.broadcast %20 : vector<1x64xf32> to vector<8x64xf32>
    %22 = arith.mulf %9, %21 : vector<8x64xf32>
    %23 = vector.broadcast %16 : vector<1x64xf32> to vector<8x64xf32>
    %24 = arith.addf %22, %23 : vector<8x64xf32>
    %cst_10 = arith.constant 0.00999999977 : f32
    %25 = vector.broadcast %cst_10 : f32 to vector<8x64xf32>
    %26 = arith.mulf %25, %24 : vector<8x64xf32>
    %27 = arith.maximumf %24, %26 : vector<8x64xf32>
    %c32 = arith.constant 32 : index
    %c0_11 = arith.constant 0 : index
    %28 = vector.load %arg1[%c32, %c0_11] : memref<176x64xf32, #tpu.memory_space<vmem>>, vector<64x32xf32>
    %29 = arith.truncf %28 : vector<64x32xf32> to vector<64x32xbf16>
    %30 = arith.truncf %27 : vector<8x64xf32> to vector<8x64xbf16>
    %cst_12 = arith.constant dense<0.000000e+00> : vector<8x32xf32>
    %31 = tpu.matmul %30, %29, %cst_12 {dimension_numbers = #tpu.dot_dimension_numbers<[1], [0], [0], [1], [0, 0, 1, 1], [], []>} : vector<8x64xbf16>, vector<64x32xbf16>, vector<8x32xf32> -> vector<8x32xf32>
    %cst_13 = arith.constant dense<0.000000e+00> : vector<32xf32>
    %32 = vector.multi_reduction <add>, %31, %cst_13 [0] : vector<8x32xf32> to vector<32xf32>
    %33 = vector.shape_cast %32 : vector<32xf32> to vector<1x32xf32>
    %cst_14 = arith.constant 1.250000e-01 : f32
    %34 = vector.broadcast %cst_14 : f32 to vector<1x32xf32>
    %35 = arith.mulf %33, %34 : vector<1x32xf32>
    %36 = vector.broadcast %35 : vector<1x32xf32> to vector<8x32xf32>
    %37 = arith.subf %31, %36 : vector<8x32xf32>
    %38 = arith.mulf %37, %37 : vector<8x32xf32>
    %cst_15 = arith.constant dense<0.000000e+00> : vector<32xf32>
    %39 = vector.multi_reduction <add>, %38, %cst_15 [0] : vector<8x32xf32> to vector<32xf32>
    %40 = vector.shape_cast %39 : vector<32xf32> to vector<1x32xf32>
    %cst_16 = arith.constant 1.250000e-01 : f32
    %41 = vector.broadcast %cst_16 : f32 to vector<1x32xf32>
    %42 = arith.mulf %40, %41 : vector<1x32xf32>
    %c159 = arith.constant 159 : index
    %c0_17 = arith.constant 0 : index
    %43 = vector.load %arg1[%c159, %c0_17] : memref<176x64xf32, #tpu.memory_space<vmem>>, vector<1x32xf32>
    %c165 = arith.constant 165 : index
    %c0_18 = arith.constant 0 : index
    %44 = vector.load %arg1[%c165, %c0_18] : memref<176x64xf32, #tpu.memory_space<vmem>>, vector<1x32xf32>
    %cst_19 = arith.constant 9.99999974E-6 : f32
    %45 = vector.broadcast %cst_19 : f32 to vector<1x32xf32>
    %46 = arith.addf %42, %45 : vector<1x32xf32>
    %47 = math.rsqrt %46 : vector<1x32xf32>
    %48 = arith.mulf %43, %47 : vector<1x32xf32>
    %49 = vector.broadcast %48 : vector<1x32xf32> to vector<8x32xf32>
    %50 = arith.mulf %37, %49 : vector<8x32xf32>
    %51 = vector.broadcast %44 : vector<1x32xf32> to vector<8x32xf32>
    %52 = arith.addf %50, %51 : vector<8x32xf32>
    %cst_20 = arith.constant 0.00999999977 : f32
    %53 = vector.broadcast %cst_20 : f32 to vector<8x32xf32>
    %54 = arith.mulf %53, %52 : vector<8x32xf32>
    %55 = arith.maximumf %52, %54 : vector<8x32xf32>
    %c96 = arith.constant 96 : index
    %c0_21 = arith.constant 0 : index
    %56 = vector.load %arg1[%c96, %c0_21] : memref<176x64xf32, #tpu.memory_space<vmem>>, vector<32x16xf32>
    %57 = arith.truncf %56 : vector<32x16xf32> to vector<32x16xbf16>
    %58 = arith.truncf %55 : vector<8x32xf32> to vector<8x32xbf16>
    %cst_22 = arith.constant dense<0.000000e+00> : vector<8x16xf32>
    %59 = tpu.matmul %58, %57, %cst_22 {dimension_numbers = #tpu.dot_dimension_numbers<[1], [0], [0], [1], [0, 0, 1, 1], [], []>} : vector<8x32xbf16>, vector<32x16xbf16>, vector<8x16xf32> -> vector<8x16xf32>
    %cst_23 = arith.constant dense<0.000000e+00> : vector<16xf32>
    %60 = vector.multi_reduction <add>, %59, %cst_23 [0] : vector<8x16xf32> to vector<16xf32>
    %61 = vector.shape_cast %60 : vector<16xf32> to vector<1x16xf32>
    %cst_24 = arith.constant 1.250000e-01 : f32
    %62 = vector.broadcast %cst_24 : f32 to vector<1x16xf32>
    %63 = arith.mulf %61, %62 : vector<1x16xf32>
    %64 = vector.broadcast %63 : vector<1x16xf32> to vector<8x16xf32>
    %65 = arith.subf %59, %64 : vector<8x16xf32>
    %66 = arith.mulf %65, %65 : vector<8x16xf32>
    %cst_25 = arith.constant dense<0.000000e+00> : vector<16xf32>
    %67 = vector.multi_reduction <add>, %66, %cst_25 [0] : vector<8x16xf32> to vector<16xf32>
    %68 = vector.shape_cast %67 : vector<16xf32> to vector<1x16xf32>
    %cst_26 = arith.constant 1.250000e-01 : f32
    %69 = vector.broadcast %cst_26 : f32 to vector<1x16xf32>
    %70 = arith.mulf %68, %69 : vector<1x16xf32>
    %c160 = arith.constant 160 : index
    %c0_27 = arith.constant 0 : index
    %71 = vector.load %arg1[%c160, %c0_27] : memref<176x64xf32, #tpu.memory_space<vmem>>, vector<1x16xf32>
    %c166 = arith.constant 166 : index
    %c0_28 = arith.constant 0 : index
    %72 = vector.load %arg1[%c166, %c0_28] : memref<176x64xf32, #tpu.memory_space<vmem>>, vector<1x16xf32>
    %cst_29 = arith.constant 9.99999974E-6 : f32
    %73 = vector.broadcast %cst_29 : f32 to vector<1x16xf32>
    %74 = arith.addf %70, %73 : vector<1x16xf32>
    %75 = math.rsqrt %74 : vector<1x16xf32>
    %76 = arith.mulf %71, %75 : vector<1x16xf32>
    %77 = vector.broadcast %76 : vector<1x16xf32> to vector<8x16xf32>
    %78 = arith.mulf %65, %77 : vector<8x16xf32>
    %79 = vector.broadcast %72 : vector<1x16xf32> to vector<8x16xf32>
    %80 = arith.addf %78, %79 : vector<8x16xf32>
    %cst_30 = arith.constant 0.00999999977 : f32
    %81 = vector.broadcast %cst_30 : f32 to vector<8x16xf32>
    %82 = arith.mulf %81, %80 : vector<8x16xf32>
    %83 = arith.maximumf %80, %82 : vector<8x16xf32>
    %84 = vector.extract_strided_slice %83 {offsets = [0, 0], sizes = [8, 1], strides = [1, 1]} : vector<8x16xf32> to vector<8x1xf32>
    %c128 = arith.constant 128 : index
    %c0_31 = arith.constant 0 : index
    %85 = vector.load %arg1[%c128, %c0_31] : memref<176x64xf32, #tpu.memory_space<vmem>>, vector<1x8xf32>
    %86 = vector.broadcast %84 : vector<8x1xf32> to vector<8x8xf32>
    %87 = vector.broadcast %85 : vector<1x8xf32> to vector<8x8xf32>
    %88 = arith.mulf %86, %87 : vector<8x8xf32>
    %89 = vector.extract_strided_slice %83 {offsets = [0, 1], sizes = [8, 1], strides = [1, 1]} : vector<8x16xf32> to vector<8x1xf32>
    %c129 = arith.constant 129 : index
    %c0_32 = arith.constant 0 : index
    %90 = vector.load %arg1[%c129, %c0_32] : memref<176x64xf32, #tpu.memory_space<vmem>>, vector<1x8xf32>
    %91 = vector.broadcast %89 : vector<8x1xf32> to vector<8x8xf32>
    %92 = vector.broadcast %90 : vector<1x8xf32> to vector<8x8xf32>
    %93 = arith.mulf %91, %92 : vector<8x8xf32>
    %94 = vector.extract_strided_slice %83 {offsets = [0, 2], sizes = [8, 1], strides = [1, 1]} : vector<8x16xf32> to vector<8x1xf32>
    %c130 = arith.constant 130 : index
    %c0_33 = arith.constant 0 : index
    %95 = vector.load %arg1[%c130, %c0_33] : memref<176x64xf32, #tpu.memory_space<vmem>>, vector<1x8xf32>
    %96 = vector.broadcast %94 : vector<8x1xf32> to vector<8x8xf32>
    %97 = vector.broadcast %95 : vector<1x8xf32> to vector<8x8xf32>
    %98 = arith.mulf %96, %97 : vector<8x8xf32>
    %99 = vector.extract_strided_slice %83 {offsets = [0, 3], sizes = [8, 1], strides = [1, 1]} : vector<8x16xf32> to vector<8x1xf32>
    %c131 = arith.constant 131 : index
    %c0_34 = arith.constant 0 : index
    %100 = vector.load %arg1[%c131, %c0_34] : memref<176x64xf32, #tpu.memory_space<vmem>>, vector<1x8xf32>
    %101 = vector.broadcast %99 : vector<8x1xf32> to vector<8x8xf32>
    %102 = vector.broadcast %100 : vector<1x8xf32> to vector<8x8xf32>
    %103 = arith.mulf %101, %102 : vector<8x8xf32>
    %104 = vector.extract_strided_slice %83 {offsets = [0, 4], sizes = [8, 1], strides = [1, 1]} : vector<8x16xf32> to vector<8x1xf32>
    %c132 = arith.constant 132 : index
    %c0_35 = arith.constant 0 : index
    %105 = vector.load %arg1[%c132, %c0_35] : memref<176x64xf32, #tpu.memory_space<vmem>>, vector<1x8xf32>
    %106 = vector.broadcast %104 : vector<8x1xf32> to vector<8x8xf32>
    %107 = vector.broadcast %105 : vector<1x8xf32> to vector<8x8xf32>
    %108 = arith.mulf %106, %107 : vector<8x8xf32>
    %109 = vector.extract_strided_slice %83 {offsets = [0, 5], sizes = [8, 1], strides = [1, 1]} : vector<8x16xf32> to vector<8x1xf32>
    %c133 = arith.constant 133 : index
    %c0_36 = arith.constant 0 : index
    %110 = vector.load %arg1[%c133, %c0_36] : memref<176x64xf32, #tpu.memory_space<vmem>>, vector<1x8xf32>
    %111 = vector.broadcast %109 : vector<8x1xf32> to vector<8x8xf32>
    %112 = vector.broadcast %110 : vector<1x8xf32> to vector<8x8xf32>
    %113 = arith.mulf %111, %112 : vector<8x8xf32>
    %114 = vector.extract_strided_slice %83 {offsets = [0, 6], sizes = [8, 1], strides = [1, 1]} : vector<8x16xf32> to vector<8x1xf32>
    %c134 = arith.constant 134 : index
    %c0_37 = arith.constant 0 : index
    %115 = vector.load %arg1[%c134, %c0_37] : memref<176x64xf32, #tpu.memory_space<vmem>>, vector<1x8xf32>
    %116 = vector.broadcast %114 : vector<8x1xf32> to vector<8x8xf32>
    %117 = vector.broadcast %115 : vector<1x8xf32> to vector<8x8xf32>
    %118 = arith.mulf %116, %117 : vector<8x8xf32>
    %119 = vector.extract_strided_slice %83 {offsets = [0, 7], sizes = [8, 1], strides = [1, 1]} : vector<8x16xf32> to vector<8x1xf32>
    %c135 = arith.constant 135 : index
    %c0_38 = arith.constant 0 : index
    %120 = vector.load %arg1[%c135, %c0_38] : memref<176x64xf32, #tpu.memory_space<vmem>>, vector<1x8xf32>
    %121 = vector.broadcast %119 : vector<8x1xf32> to vector<8x8xf32>
    %122 = vector.broadcast %120 : vector<1x8xf32> to vector<8x8xf32>
    %123 = arith.mulf %121, %122 : vector<8x8xf32>
    %124 = vector.extract_strided_slice %83 {offsets = [0, 8], sizes = [8, 1], strides = [1, 1]} : vector<8x16xf32> to vector<8x1xf32>
    %c136 = arith.constant 136 : index
    %c0_39 = arith.constant 0 : index
    %125 = vector.load %arg1[%c136, %c0_39] : memref<176x64xf32, #tpu.memory_space<vmem>>, vector<1x8xf32>
    %126 = vector.broadcast %124 : vector<8x1xf32> to vector<8x8xf32>
    %127 = vector.broadcast %125 : vector<1x8xf32> to vector<8x8xf32>
    %128 = arith.mulf %126, %127 : vector<8x8xf32>
    %129 = vector.extract_strided_slice %83 {offsets = [0, 9], sizes = [8, 1], strides = [1, 1]} : vector<8x16xf32> to vector<8x1xf32>
    %c137 = arith.constant 137 : index
    %c0_40 = arith.constant 0 : index
    %130 = vector.load %arg1[%c137, %c0_40] : memref<176x64xf32, #tpu.memory_space<vmem>>, vector<1x8xf32>
    %131 = vector.broadcast %129 : vector<8x1xf32> to vector<8x8xf32>
    %132 = vector.broadcast %130 : vector<1x8xf32> to vector<8x8xf32>
    %133 = arith.mulf %131, %132 : vector<8x8xf32>
    %134 = vector.extract_strided_slice %83 {offsets = [0, 10], sizes = [8, 1], strides = [1, 1]} : vector<8x16xf32> to vector<8x1xf32>
    %c138 = arith.constant 138 : index
    %c0_41 = arith.constant 0 : index
    %135 = vector.load %arg1[%c138, %c0_41] : memref<176x64xf32, #tpu.memory_space<vmem>>, vector<1x8xf32>
    %136 = vector.broadcast %134 : vector<8x1xf32> to vector<8x8xf32>
    %137 = vector.broadcast %135 : vector<1x8xf32> to vector<8x8xf32>
    %138 = arith.mulf %136, %137 : vector<8x8xf32>
    %139 = vector.extract_strided_slice %83 {offsets = [0, 11], sizes = [8, 1], strides = [1, 1]} : vector<8x16xf32> to vector<8x1xf32>
    %c139 = arith.constant 139 : index
    %c0_42 = arith.constant 0 : index
    %140 = vector.load %arg1[%c139, %c0_42] : memref<176x64xf32, #tpu.memory_space<vmem>>, vector<1x8xf32>
    %141 = vector.broadcast %139 : vector<8x1xf32> to vector<8x8xf32>
    %142 = vector.broadcast %140 : vector<1x8xf32> to vector<8x8xf32>
    %143 = arith.mulf %141, %142 : vector<8x8xf32>
    %144 = vector.extract_strided_slice %83 {offsets = [0, 12], sizes = [8, 1], strides = [1, 1]} : vector<8x16xf32> to vector<8x1xf32>
    %c140 = arith.constant 140 : index
    %c0_43 = arith.constant 0 : index
    %145 = vector.load %arg1[%c140, %c0_43] : memref<176x64xf32, #tpu.memory_space<vmem>>, vector<1x8xf32>
    %146 = vector.broadcast %144 : vector<8x1xf32> to vector<8x8xf32>
    %147 = vector.broadcast %145 : vector<1x8xf32> to vector<8x8xf32>
    %148 = arith.mulf %146, %147 : vector<8x8xf32>
    %149 = vector.extract_strided_slice %83 {offsets = [0, 13], sizes = [8, 1], strides = [1, 1]} : vector<8x16xf32> to vector<8x1xf32>
    %c141 = arith.constant 141 : index
    %c0_44 = arith.constant 0 : index
    %150 = vector.load %arg1[%c141, %c0_44] : memref<176x64xf32, #tpu.memory_space<vmem>>, vector<1x8xf32>
    %151 = vector.broadcast %149 : vector<8x1xf32> to vector<8x8xf32>
    %152 = vector.broadcast %150 : vector<1x8xf32> to vector<8x8xf32>
    %153 = arith.mulf %151, %152 : vector<8x8xf32>
    %154 = vector.extract_strided_slice %83 {offsets = [0, 14], sizes = [8, 1], strides = [1, 1]} : vector<8x16xf32> to vector<8x1xf32>
    %c142 = arith.constant 142 : index
    %c0_45 = arith.constant 0 : index
    %155 = vector.load %arg1[%c142, %c0_45] : memref<176x64xf32, #tpu.memory_space<vmem>>, vector<1x8xf32>
    %156 = vector.broadcast %154 : vector<8x1xf32> to vector<8x8xf32>
    %157 = vector.broadcast %155 : vector<1x8xf32> to vector<8x8xf32>
    %158 = arith.mulf %156, %157 : vector<8x8xf32>
    %159 = vector.extract_strided_slice %83 {offsets = [0, 15], sizes = [8, 1], strides = [1, 1]} : vector<8x16xf32> to vector<8x1xf32>
    %c143 = arith.constant 143 : index
    %c0_46 = arith.constant 0 : index
    %160 = vector.load %arg1[%c143, %c0_46] : memref<176x64xf32, #tpu.memory_space<vmem>>, vector<1x8xf32>
    %161 = vector.broadcast %159 : vector<8x1xf32> to vector<8x8xf32>
    %162 = vector.broadcast %160 : vector<1x8xf32> to vector<8x8xf32>
    %163 = arith.mulf %161, %162 : vector<8x8xf32>
    %164 = arith.addf %88, %93 : vector<8x8xf32>
    %165 = arith.addf %98, %103 : vector<8x8xf32>
    %166 = arith.addf %108, %113 : vector<8x8xf32>
    %167 = arith.addf %118, %123 : vector<8x8xf32>
    %168 = arith.addf %128, %133 : vector<8x8xf32>
    %169 = arith.addf %138, %143 : vector<8x8xf32>
    %170 = arith.addf %148, %153 : vector<8x8xf32>
    %171 = arith.addf %158, %163 : vector<8x8xf32>
    %172 = arith.addf %164, %165 : vector<8x8xf32>
    %173 = arith.addf %166, %167 : vector<8x8xf32>
    %174 = arith.addf %168, %169 : vector<8x8xf32>
    %175 = arith.addf %170, %171 : vector<8x8xf32>
    %176 = arith.addf %172, %173 : vector<8x8xf32>
    %177 = arith.addf %174, %175 : vector<8x8xf32>
    %178 = arith.addf %176, %177 : vector<8x8xf32>
    %cst_47 = arith.constant dense<0.000000e+00> : vector<8xf32>
    %179 = vector.multi_reduction <add>, %178, %cst_47 [0] : vector<8x8xf32> to vector<8xf32>
    %180 = vector.shape_cast %179 : vector<8xf32> to vector<1x8xf32>
    %cst_48 = arith.constant 1.250000e-01 : f32
    %181 = vector.broadcast %cst_48 : f32 to vector<1x8xf32>
    %182 = arith.mulf %180, %181 : vector<1x8xf32>
    %183 = vector.broadcast %182 : vector<1x8xf32> to vector<8x8xf32>
    %184 = arith.subf %178, %183 : vector<8x8xf32>
    %185 = arith.mulf %184, %184 : vector<8x8xf32>
    %cst_49 = arith.constant dense<0.000000e+00> : vector<8xf32>
    %186 = vector.multi_reduction <add>, %185, %cst_49 [0] : vector<8x8xf32> to vector<8xf32>
    %187 = vector.shape_cast %186 : vector<8xf32> to vector<1x8xf32>
    %cst_50 = arith.constant 1.250000e-01 : f32
    %188 = vector.broadcast %cst_50 : f32 to vector<1x8xf32>
    %189 = arith.mulf %187, %188 : vector<1x8xf32>
    %c161 = arith.constant 161 : index
    %c0_51 = arith.constant 0 : index
    %190 = vector.load %arg1[%c161, %c0_51] : memref<176x64xf32, #tpu.memory_space<vmem>>, vector<1x8xf32>
    %c167 = arith.constant 167 : index
    %c0_52 = arith.constant 0 : index
    %191 = vector.load %arg1[%c167, %c0_52] : memref<176x64xf32, #tpu.memory_space<vmem>>, vector<1x8xf32>
    %cst_53 = arith.constant 9.99999974E-6 : f32
    %192 = vector.broadcast %cst_53 : f32 to vector<1x8xf32>
    %193 = arith.addf %189, %192 : vector<1x8xf32>
    %194 = math.rsqrt %193 : vector<1x8xf32>
    %195 = arith.mulf %190, %194 : vector<1x8xf32>
    %196 = vector.broadcast %195 : vector<1x8xf32> to vector<8x8xf32>
    %197 = arith.mulf %184, %196 : vector<8x8xf32>
    %198 = vector.broadcast %191 : vector<1x8xf32> to vector<8x8xf32>
    %199 = arith.addf %197, %198 : vector<8x8xf32>
    %cst_54 = arith.constant 0.00999999977 : f32
    %200 = vector.broadcast %cst_54 : f32 to vector<8x8xf32>
    %201 = arith.mulf %200, %199 : vector<8x8xf32>
    %202 = arith.maximumf %199, %201 : vector<8x8xf32>
    %203 = vector.extract_strided_slice %202 {offsets = [0, 0], sizes = [8, 1], strides = [1, 1]} : vector<8x8xf32> to vector<8x1xf32>
    %c144 = arith.constant 144 : index
    %c0_55 = arith.constant 0 : index
    %204 = vector.load %arg1[%c144, %c0_55] : memref<176x64xf32, #tpu.memory_space<vmem>>, vector<1x4xf32>
    %205 = vector.broadcast %203 : vector<8x1xf32> to vector<8x4xf32>
    %206 = vector.broadcast %204 : vector<1x4xf32> to vector<8x4xf32>
    %207 = arith.mulf %205, %206 : vector<8x4xf32>
    %208 = vector.extract_strided_slice %202 {offsets = [0, 1], sizes = [8, 1], strides = [1, 1]} : vector<8x8xf32> to vector<8x1xf32>
    %c145 = arith.constant 145 : index
    %c0_56 = arith.constant 0 : index
    %209 = vector.load %arg1[%c145, %c0_56] : memref<176x64xf32, #tpu.memory_space<vmem>>, vector<1x4xf32>
    %210 = vector.broadcast %208 : vector<8x1xf32> to vector<8x4xf32>
    %211 = vector.broadcast %209 : vector<1x4xf32> to vector<8x4xf32>
    %212 = arith.mulf %210, %211 : vector<8x4xf32>
    %213 = vector.extract_strided_slice %202 {offsets = [0, 2], sizes = [8, 1], strides = [1, 1]} : vector<8x8xf32> to vector<8x1xf32>
    %c146 = arith.constant 146 : index
    %c0_57 = arith.constant 0 : index
    %214 = vector.load %arg1[%c146, %c0_57] : memref<176x64xf32, #tpu.memory_space<vmem>>, vector<1x4xf32>
    %215 = vector.broadcast %213 : vector<8x1xf32> to vector<8x4xf32>
    %216 = vector.broadcast %214 : vector<1x4xf32> to vector<8x4xf32>
    %217 = arith.mulf %215, %216 : vector<8x4xf32>
    %218 = vector.extract_strided_slice %202 {offsets = [0, 3], sizes = [8, 1], strides = [1, 1]} : vector<8x8xf32> to vector<8x1xf32>
    %c147 = arith.constant 147 : index
    %c0_58 = arith.constant 0 : index
    %219 = vector.load %arg1[%c147, %c0_58] : memref<176x64xf32, #tpu.memory_space<vmem>>, vector<1x4xf32>
    %220 = vector.broadcast %218 : vector<8x1xf32> to vector<8x4xf32>
    %221 = vector.broadcast %219 : vector<1x4xf32> to vector<8x4xf32>
    %222 = arith.mulf %220, %221 : vector<8x4xf32>
    %223 = vector.extract_strided_slice %202 {offsets = [0, 4], sizes = [8, 1], strides = [1, 1]} : vector<8x8xf32> to vector<8x1xf32>
    %c148 = arith.constant 148 : index
    %c0_59 = arith.constant 0 : index
    %224 = vector.load %arg1[%c148, %c0_59] : memref<176x64xf32, #tpu.memory_space<vmem>>, vector<1x4xf32>
    %225 = vector.broadcast %223 : vector<8x1xf32> to vector<8x4xf32>
    %226 = vector.broadcast %224 : vector<1x4xf32> to vector<8x4xf32>
    %227 = arith.mulf %225, %226 : vector<8x4xf32>
    %228 = vector.extract_strided_slice %202 {offsets = [0, 5], sizes = [8, 1], strides = [1, 1]} : vector<8x8xf32> to vector<8x1xf32>
    %c149 = arith.constant 149 : index
    %c0_60 = arith.constant 0 : index
    %229 = vector.load %arg1[%c149, %c0_60] : memref<176x64xf32, #tpu.memory_space<vmem>>, vector<1x4xf32>
    %230 = vector.broadcast %228 : vector<8x1xf32> to vector<8x4xf32>
    %231 = vector.broadcast %229 : vector<1x4xf32> to vector<8x4xf32>
    %232 = arith.mulf %230, %231 : vector<8x4xf32>
    %233 = vector.extract_strided_slice %202 {offsets = [0, 6], sizes = [8, 1], strides = [1, 1]} : vector<8x8xf32> to vector<8x1xf32>
    %c150 = arith.constant 150 : index
    %c0_61 = arith.constant 0 : index
    %234 = vector.load %arg1[%c150, %c0_61] : memref<176x64xf32, #tpu.memory_space<vmem>>, vector<1x4xf32>
    %235 = vector.broadcast %233 : vector<8x1xf32> to vector<8x4xf32>
    %236 = vector.broadcast %234 : vector<1x4xf32> to vector<8x4xf32>
    %237 = arith.mulf %235, %236 : vector<8x4xf32>
    %238 = vector.extract_strided_slice %202 {offsets = [0, 7], sizes = [8, 1], strides = [1, 1]} : vector<8x8xf32> to vector<8x1xf32>
    %c151 = arith.constant 151 : index
    %c0_62 = arith.constant 0 : index
    %239 = vector.load %arg1[%c151, %c0_62] : memref<176x64xf32, #tpu.memory_space<vmem>>, vector<1x4xf32>
    %240 = vector.broadcast %238 : vector<8x1xf32> to vector<8x4xf32>
    %241 = vector.broadcast %239 : vector<1x4xf32> to vector<8x4xf32>
    %242 = arith.mulf %240, %241 : vector<8x4xf32>
    %243 = arith.addf %207, %212 : vector<8x4xf32>
    %244 = arith.addf %217, %222 : vector<8x4xf32>
    %245 = arith.addf %227, %232 : vector<8x4xf32>
    %246 = arith.addf %237, %242 : vector<8x4xf32>
    %247 = arith.addf %243, %244 : vector<8x4xf32>
    %248 = arith.addf %245, %246 : vector<8x4xf32>
    %249 = arith.addf %247, %248 : vector<8x4xf32>
    %cst_63 = arith.constant dense<0.000000e+00> : vector<4xf32>
    %250 = vector.multi_reduction <add>, %249, %cst_63 [0] : vector<8x4xf32> to vector<4xf32>
    %251 = vector.shape_cast %250 : vector<4xf32> to vector<1x4xf32>
    %cst_64 = arith.constant 1.250000e-01 : f32
    %252 = vector.broadcast %cst_64 : f32 to vector<1x4xf32>
    %253 = arith.mulf %251, %252 : vector<1x4xf32>
    %254 = vector.broadcast %253 : vector<1x4xf32> to vector<8x4xf32>
    %255 = arith.subf %249, %254 : vector<8x4xf32>
    %256 = arith.mulf %255, %255 : vector<8x4xf32>
    %cst_65 = arith.constant dense<0.000000e+00> : vector<4xf32>
    %257 = vector.multi_reduction <add>, %256, %cst_65 [0] : vector<8x4xf32> to vector<4xf32>
    %258 = vector.shape_cast %257 : vector<4xf32> to vector<1x4xf32>
    %cst_66 = arith.constant 1.250000e-01 : f32
    %259 = vector.broadcast %cst_66 : f32 to vector<1x4xf32>
    %260 = arith.mulf %258, %259 : vector<1x4xf32>
    %c162 = arith.constant 162 : index
    %c0_67 = arith.constant 0 : index
    %261 = vector.load %arg1[%c162, %c0_67] : memref<176x64xf32, #tpu.memory_space<vmem>>, vector<1x4xf32>
    %c168 = arith.constant 168 : index
    %c0_68 = arith.constant 0 : index
    %262 = vector.load %arg1[%c168, %c0_68] : memref<176x64xf32, #tpu.memory_space<vmem>>, vector<1x4xf32>
    %cst_69 = arith.constant 9.99999974E-6 : f32
    %263 = vector.broadcast %cst_69 : f32 to vector<1x4xf32>
    %264 = arith.addf %260, %263 : vector<1x4xf32>
    %265 = math.rsqrt %264 : vector<1x4xf32>
    %266 = arith.mulf %261, %265 : vector<1x4xf32>
    %267 = vector.broadcast %266 : vector<1x4xf32> to vector<8x4xf32>
    %268 = arith.mulf %255, %267 : vector<8x4xf32>
    %269 = vector.broadcast %262 : vector<1x4xf32> to vector<8x4xf32>
    %270 = arith.addf %268, %269 : vector<8x4xf32>
    %cst_70 = arith.constant 0.00999999977 : f32
    %271 = vector.broadcast %cst_70 : f32 to vector<8x4xf32>
    %272 = arith.mulf %271, %270 : vector<8x4xf32>
    %273 = arith.maximumf %270, %272 : vector<8x4xf32>
    %274 = vector.extract_strided_slice %273 {offsets = [0, 0], sizes = [8, 1], strides = [1, 1]} : vector<8x4xf32> to vector<8x1xf32>
    %c152 = arith.constant 152 : index
    %c0_71 = arith.constant 0 : index
    %275 = vector.load %arg1[%c152, %c0_71] : memref<176x64xf32, #tpu.memory_space<vmem>>, vector<1x2xf32>
    %276 = vector.broadcast %274 : vector<8x1xf32> to vector<8x2xf32>
    %277 = vector.broadcast %275 : vector<1x2xf32> to vector<8x2xf32>
    %278 = arith.mulf %276, %277 : vector<8x2xf32>
    %279 = vector.extract_strided_slice %273 {offsets = [0, 1], sizes = [8, 1], strides = [1, 1]} : vector<8x4xf32> to vector<8x1xf32>
    %c153 = arith.constant 153 : index
    %c0_72 = arith.constant 0 : index
    %280 = vector.load %arg1[%c153, %c0_72] : memref<176x64xf32, #tpu.memory_space<vmem>>, vector<1x2xf32>
    %281 = vector.broadcast %279 : vector<8x1xf32> to vector<8x2xf32>
    %282 = vector.broadcast %280 : vector<1x2xf32> to vector<8x2xf32>
    %283 = arith.mulf %281, %282 : vector<8x2xf32>
    %284 = vector.extract_strided_slice %273 {offsets = [0, 2], sizes = [8, 1], strides = [1, 1]} : vector<8x4xf32> to vector<8x1xf32>
    %c154 = arith.constant 154 : index
    %c0_73 = arith.constant 0 : index
    %285 = vector.load %arg1[%c154, %c0_73] : memref<176x64xf32, #tpu.memory_space<vmem>>, vector<1x2xf32>
    %286 = vector.broadcast %284 : vector<8x1xf32> to vector<8x2xf32>
    %287 = vector.broadcast %285 : vector<1x2xf32> to vector<8x2xf32>
    %288 = arith.mulf %286, %287 : vector<8x2xf32>
    %289 = vector.extract_strided_slice %273 {offsets = [0, 3], sizes = [8, 1], strides = [1, 1]} : vector<8x4xf32> to vector<8x1xf32>
    %c155 = arith.constant 155 : index
    %c0_74 = arith.constant 0 : index
    %290 = vector.load %arg1[%c155, %c0_74] : memref<176x64xf32, #tpu.memory_space<vmem>>, vector<1x2xf32>
    %291 = vector.broadcast %289 : vector<8x1xf32> to vector<8x2xf32>
    %292 = vector.broadcast %290 : vector<1x2xf32> to vector<8x2xf32>
    %293 = arith.mulf %291, %292 : vector<8x2xf32>
    %294 = arith.addf %278, %283 : vector<8x2xf32>
    %295 = arith.addf %288, %293 : vector<8x2xf32>
    %296 = arith.addf %294, %295 : vector<8x2xf32>
    %cst_75 = arith.constant dense<0.000000e+00> : vector<2xf32>
    %297 = vector.multi_reduction <add>, %296, %cst_75 [0] : vector<8x2xf32> to vector<2xf32>
    %298 = vector.shape_cast %297 : vector<2xf32> to vector<1x2xf32>
    %cst_76 = arith.constant 1.250000e-01 : f32
    %299 = vector.broadcast %cst_76 : f32 to vector<1x2xf32>
    %300 = arith.mulf %298, %299 : vector<1x2xf32>
    %301 = vector.broadcast %300 : vector<1x2xf32> to vector<8x2xf32>
    %302 = arith.subf %296, %301 : vector<8x2xf32>
    %303 = arith.mulf %302, %302 : vector<8x2xf32>
    %cst_77 = arith.constant dense<0.000000e+00> : vector<2xf32>
    %304 = vector.multi_reduction <add>, %303, %cst_77 [0] : vector<8x2xf32> to vector<2xf32>
    %305 = vector.shape_cast %304 : vector<2xf32> to vector<1x2xf32>
    %cst_78 = arith.constant 1.250000e-01 : f32
    %306 = vector.broadcast %cst_78 : f32 to vector<1x2xf32>
    %307 = arith.mulf %305, %306 : vector<1x2xf32>
    %c163 = arith.constant 163 : index
    %c0_79 = arith.constant 0 : index
    %308 = vector.load %arg1[%c163, %c0_79] : memref<176x64xf32, #tpu.memory_space<vmem>>, vector<1x2xf32>
    %c169 = arith.constant 169 : index
    %c0_80 = arith.constant 0 : index
    %309 = vector.load %arg1[%c169, %c0_80] : memref<176x64xf32, #tpu.memory_space<vmem>>, vector<1x2xf32>
    %cst_81 = arith.constant 9.99999974E-6 : f32
    %310 = vector.broadcast %cst_81 : f32 to vector<1x2xf32>
    %311 = arith.addf %307, %310 : vector<1x2xf32>
    %312 = math.rsqrt %311 : vector<1x2xf32>
    %313 = arith.mulf %308, %312 : vector<1x2xf32>
    %314 = vector.broadcast %313 : vector<1x2xf32> to vector<8x2xf32>
    %315 = arith.mulf %302, %314 : vector<8x2xf32>
    %316 = vector.broadcast %309 : vector<1x2xf32> to vector<8x2xf32>
    %317 = arith.addf %315, %316 : vector<8x2xf32>
    %cst_82 = arith.constant 0.00999999977 : f32
    %318 = vector.broadcast %cst_82 : f32 to vector<8x2xf32>
    %319 = arith.mulf %318, %317 : vector<8x2xf32>
    %320 = arith.maximumf %317, %319 : vector<8x2xf32>
    %c170 = arith.constant 170 : index
    %c0_83 = arith.constant 0 : index
    %321 = vector.load %arg1[%c170, %c0_83] : memref<176x64xf32, #tpu.memory_space<vmem>>, vector<1x1xf32>
    %322 = vector.extract_strided_slice %320 {offsets = [0, 0], sizes = [8, 1], strides = [1, 1]} : vector<8x2xf32> to vector<8x1xf32>
    %c156 = arith.constant 156 : index
    %c0_84 = arith.constant 0 : index
    %323 = vector.load %arg1[%c156, %c0_84] : memref<176x64xf32, #tpu.memory_space<vmem>>, vector<1x1xf32>
    %324 = vector.broadcast %323 : vector<1x1xf32> to vector<8x1xf32>
    %325 = arith.mulf %322, %324 : vector<8x1xf32>
    %326 = vector.extract_strided_slice %320 {offsets = [0, 1], sizes = [8, 1], strides = [1, 1]} : vector<8x2xf32> to vector<8x1xf32>
    %c157 = arith.constant 157 : index
    %c0_85 = arith.constant 0 : index
    %327 = vector.load %arg1[%c157, %c0_85] : memref<176x64xf32, #tpu.memory_space<vmem>>, vector<1x1xf32>
    %328 = vector.broadcast %327 : vector<1x1xf32> to vector<8x1xf32>
    %329 = arith.mulf %326, %328 : vector<8x1xf32>
    %330 = arith.addf %325, %329 : vector<8x1xf32>
    %331 = vector.broadcast %321 : vector<1x1xf32> to vector<8x1xf32>
    %332 = arith.addf %330, %331 : vector<8x1xf32>
    %cst_86 = arith.constant 0.000000e+00 : f32
    %333 = vector.broadcast %cst_86 : f32 to vector<8x1xf32>
    %334 = arith.subf %333, %332 : vector<8x1xf32>
    %335 = math.exp %334 : vector<8x1xf32>
    %cst_87 = arith.constant 1.000000e+00 : f32
    %336 = vector.broadcast %cst_87 : f32 to vector<8x1xf32>
    %337 = arith.addf %336, %335 : vector<8x1xf32>
    %338 = tpu.reciprocal %337 {approx = true} : vector<8x1xf32> -> vector<8x1xf32>
    %cst_88 = arith.constant 0.000000e+00 : f32
    %339 = vector.broadcast %cst_88 : f32 to vector<8x125xf32>
    %340 = tpu.concatenate %320, %338, %339 in 1 : vector<8x2xf32>, vector<8x1xf32>, vector<8x125xf32> -> vector<8x128xf32>
    %c0_89 = arith.constant 0 : index
    %c0_90 = arith.constant 0 : index
    %341 = vector.load %arg2[%c0_89, %c0_90] : memref<8x128xf32, #tpu.memory_space<vmem>>, vector<8x128xf32>
    tpu.vector_store %arg2[%c0_89, %c0_90], %340 {strides = array<i32>} : memref<8x128xf32, #tpu.memory_space<vmem>>, vector<8x128xf32>,
    return
  }
}

</mosaic_0001>

<bundles_post_ra>
// kernel: classifier_forward.1
= control target key start
LH: loop header
LB: loop body
LE: loop exit
PB: predicated region body
PF: predicated region fallthrough
CT: control target
= control target key end

     0   :  { %v881_v0 = vmov 0.0   ;;  %vm882_vm0 = vmmov 0   ;;  %vm19_vm1 = vcmask 261120   ;;  %vm63_vm2 = vcmask 523264   ;;  %s899_s25 = smov 1   ;;  %s900_s10 = smov 127   ;;  %s1150_s1 = inlined_call_operand.vmem [shape: f32[176,64], index: 1, kind: input, shape index: {}]   ;;  %s1151_s0 = inlined_call_operand.vmem [shape: bf16[8,32], index: 0, kind: input, shape index: {}]   ;;  %s1152_s2 = inlined_call_operand.vmem [shape: f32[8,128], index: 2, kind: output, shape index: {}]  }
   0x1   :  { %787 = vmatprep.subr.bf16.mxu0 %v881_v0  ;;  %v13_v1 = vld [vmem:[%s1150_s1] sm:$0xff]  ;;  %v14_v2 = vld [vmem:[%s1150_s1 + $0x8] sm:$0xff]  ;;  %v15_v3 = vld [vmem:[%s1150_s1 + $0x10] sm:$0xff]  ;;  %791 = vmatprep.mubr.msk.bf16.mxu0 %vm882_vm0, %v881_v0  ;;  %v87_v43 = vlaneseq  ;;  %vm240_vm3 = vcmask 130048   ;;  %vm452_vm4 = vcmask 64512   ;;  %vm576_vm5 = vcmask 31744  }
   0x2   :  { %v17_v4 = vpack.c.bf16 %v14_v2, %v13_v1  ;;  %v16_v5 = vld [vmem:[%s1150_s1 + $0x18] sm:$0xff]  ;;  %795 = vmatprep.subr.bf16.mxu1 %v881_v0  ;;  %803 = vmatprep.mubr.msk.bf16.mxu1 %vm882_vm0, %v881_v0  ;;  %v12_v7 = vld [vmem:[%s1151_s0] sm:$0xf]  ;;  %v100_v9 = vld [vmem:[%s1150_s1 + $0x28] sm:$0xff]  ;;  %vm656_vm6 = vcmask 15360   ;;  %s901_s15 = smov 2  }
   0x3   :  { %v18_v6 = vpack.c.bf16 %v16_v5, %v15_v3  ;;  %v99_v8 = vld [vmem:[%s1150_s1 + $0x20] sm:$0xff]  ;;  %v101_v11 = vld [vmem:[%s1150_s1 + $0x30] sm:$0xff]  ;;  %v102_v12 = vld [vmem:[%s1150_s1 + $0x38] sm:$0xff]  ;;  %v88_v44 = vshrl.u32 %v87_v43, 7  ;;  %vm729_vm7 = vcmask 23552  }
   0x4   :  { %788 = vmatpush3.bf16.msra.mxu0 %v17_v4  ;;  %v107_v10 = vpack.c.bf16 %v100_v9, %v99_v8  ;;  %v108_v13 = vpack.c.bf16 %v102_v12, %v101_v11  ;;  %v103_v14 = vld [vmem:[%s1150_s1 + $0x40] sm:$0xff]  ;;  %v104_v15 = vld [vmem:[%s1150_s1 + $0x48] sm:$0xff]  ;;  %v105_v17 = vld [vmem:[%s1150_s1 + $0x50] sm:$0xff] }
   0x5   :  { %789 = vmatprep.subr.bf16.mxu0 %v881_v0  ;;  %v109_v16 = vpack.c.bf16 %v104_v15, %v103_v14  ;;  %v106_v18 = vld [vmem:[%s1150_s1 + $0x58] sm:$0xff]  ;;  %v972_v46 = vsub.s32 0, %v88_v44  ;;  %v737_v50 = vld [vmem:[%s1150_s1 + $0xa4] ss:$0 sm:$0xff]  ;;  %v191_v57 = vld [vmem:[%s1150_s1 + $0x68] sm:$0xff] }
   0x6   :  { %796 = vmatpush3.bf16.msra.mxu1 %v107_v10  ;;  %v110_v19 = vpack.c.bf16 %v106_v18, %v105_v17  ;;  %v82_v45 = vld [vmem:[%s1150_s1 + $0x9e] sm:$0x1]  ;;  %v190_v56 = vld [vmem:[%s1150_s1 + $0x60] sm:$0xff]  ;;  %v192_v59 = vld [vmem:[%s1150_s1 + $0x70] sm:$0xff] }
   0x7   :  { %797 = vmatprep.subr.bf16.mxu1 %v881_v0  ;;  %v194_v58 = vpack.c.bf16 %v191_v57, %v190_v56  ;;  %v193_v60 = vld [vmem:[%s1150_s1 + $0x78] sm:$0xff]  ;;  %v259_v57 = vld [vmem:[%s1150_s1 + $0xa0] sm:$0x1] }
   0x8   :  { %790 = vmatpush3.bf16.msra.mxu0 %v18_v6  ;;  %v195_v61 = vpack.c.bf16 %v193_v60, %v192_v59 }
   0x9   :  { %807 = vmatprep.subr.bf16.mxu0 %v881_v0 }
   0xa   :  { %798 = vmatpush3.bf16.msra.mxu1 %v108_v13 }
   0xb   :  { %792 = vmatmul.mubr.msk.bf16.vlgmr.msra.gmra.mrb[0].mxu0 %vm19_vm1, %v12_v7  ;;  %799 = vmatprep.subr.bf16.mxu1 %v881_v0 }
   0xc   :  { %811 = vmatprep.mubr.msk.bf16.mxu0 %vm882_vm0, %v881_v0  ;;  %808 = vmatpush3.bf16.msra.mxu0 %v194_v58 }
   0xd   :  { %809 = vmatprep.subr.bf16.mxu0 %v881_v0 }
   0xe   :  { %800 = vmatpush3.bf16.msra.mxu1 %v109_v16 }
   0xf   :  { %801 = vmatprep.subr.bf16.mxu1 %v881_v0 }
  0x10   :  { %810 = vmatpush3.bf16.msra.mxu0 %v195_v61  ;;  %v741_v61 = vld [vmem:[%s1150_s1 + $0xa6] ss:$0 sm:$0xff] }
  0x12   :  { %802 = vmatpush3.bf16.msra.mxu1 %v110_v19 }
  0xde   :  { %v57_v20 = vpop.f32.mrb[0].mxu0 }
  0xdf   :  { %v64_v21 = vsel %vm63_vm2, %v57_v20, 0.0  ;;  %v793_v22 = vpop.f32.mrb[1].mxu0 }
  0xe0   :  { %v65_v23 = vrot.slane %v64_v21, 4  ;;  %v60_v24 = vpop.f32.mrb[2].mxu0 }
  0xe1   :  { %v794_v25 = vpop.f32.mrb[3].mxu0 }
  0xe2   :  { %v66_v26 = vadd.f32 %v65_v23, %v64_v21  ;;  %v173_v21 = vld [vmem:[%s1150_s1 + $0x9f] sm:$0x1]  ;;  %v739_v25 = vld [vmem:[%s1150_s1 + $0xa5] ss:$0 sm:$0xff] }
  0xe4   :  { %v67_v27 = vrot.slane %v66_v26, 2 }
  0xe6   :  { %v68_v28 = vadd.f32 %v67_v27, %v66_v26 }
  0xe8   :  { %v69_v29 = vrot.slane %v68_v28, 1 }
  0xea   :  { %v70_v30 = vadd.f32 %v69_v29, %v68_v28 }
  0xec   :  { %v71_v31 = vmul.f32 0.125, %v70_v30 }
  0xee   :  { %v72_v32 = vsub.f32 %v57_v20, %v71_v31  ;;  %v883_v31 = vmov 2  }
  0xef   :  { %838 = vset.pattern.permute.xlu1 %v883_v31 }
  0xf0   :  { %v73_v33 = vmul.f32 %v72_v32, %v72_v32 }
  0xf2   :  { %v74_v34 = vsel %vm63_vm2, %v73_v33, 0.0 }
  0xf3   :  { %v75_v35 = vrot.slane %v74_v34, 4 }
  0xf5   :  { %v76_v36 = vadd.f32 %v75_v35, %v74_v34 }
  0xf7   :  { %v77_v37 = vrot.slane %v76_v36, 2 }
  0xf9   :  { %v78_v38 = vadd.f32 %v77_v37, %v76_v36 }
  0xfb   :  { %v79_v39 = vrot.slane %v78_v38, 1 }
  0xfd   :  { %v80_v40 = vadd.f32 %v79_v39, %v78_v38 }
  0xff   :  { %v81_v41 = vmul.f32 0.125, %v80_v40 }
 0x101   :  { %v84_v42 = vadd.f32 1e-05, %v81_v41 }
 0x103   :  { %865 = vrsqrt.f32 %v84_v42 }
 0x10d   :  { %v866_v47 = vpop.eup %865 }
 0x10e   :  { %v86_v48 = vmul.f32 %v866_v47, %v82_v45 }
 0x110   :  { %v90_v49 = vrot.slane %v86_v48, %v972_v46 }
 0x112   :  { %v91_v51 = vmul.f32 %v90_v49, %v72_v32  ;;  %v884_v32 = vmov 0  }
 0x113   :  { %836 = vset.pattern.permute.xlu0 %v884_v32 }
 0x114   :  { %v96_v52 = vadd.f32 %v737_v50, %v91_v51 }
 0x116   :  { %v97_v53 = vmul.f32 0.01, %v96_v52 }
 0x118   :  { %v98_v54 = vmax.f32 %v96_v52, %v97_v53 }
 0x11a   :  { %v111_v55 = vpack.c.bf16 %v98_v54, %v98_v54 }
 0x11c   :  { %804 = vmatmul.mubr.msk.bf16.vlgmr.msra.gmra.mrb[0].mxu1 %vm63_vm2, %v111_v55 }
 0x1ef   :  { %v149_v62 = vpop.f32.mrb[0].mxu1 }
 0x1f0   :  { %v155_v63 = vsel %vm19_vm1, %v149_v62, 0.0  ;;  %v805_v1 = vpop.f32.mrb[1].mxu1 }
 0x1f1   :  { %v156_v2 = vrot.slane %v155_v63, 4  ;;  %v152_v3 = vpop.f32.mrb[2].mxu1 }
 0x1f2   :  { %v806_v4 = vpop.f32.mrb[3].mxu1  ;;  %v885_v3 = vmov 3  }
 0x1f3   :  { %v157_v5 = vadd.f32 %v156_v2, %v155_v63  ;;  %v886_v4 = vmov 1  }
 0x1f5   :  { %v158_v6 = vrot.slane %v157_v5, 2 }
 0x1f7   :  { %v159_v0 = vadd.f32 %v158_v6, %v157_v5  ;;  %v887_v5 = vmov 4   ;;  %v888_v6 = vmov 5  }
 0x1f9   :  { %v160_v7 = vrot.slane %v159_v0, 1 }
 0x1fb   :  { %v161_v8 = vadd.f32 %v160_v7, %v159_v0  ;;  %v889_v0 = vmov 6   ;;  %v890_v7 = vmov 8  }
 0x1fd   :  { %v162_v9 = vmul.f32 0.125, %v161_v8  ;;  %v891_v8 = vmov 7  }
 0x1ff   :  { %v163_v10 = vsub.f32 %v149_v62, %v162_v9  ;;  %v892_v9 = vmov 11  }
 0x201   :  { %v164_v11 = vmul.f32 %v163_v10, %v163_v10 }
 0x203   :  { %v165_v12 = vsel %vm19_vm1, %v164_v11, 0.0  ;;  %v894_v11 = vmov 14  }
 0x204   :  { %v166_v13 = vrot.slane %v165_v12, 4 }
 0x206   :  { %v167_v14 = vadd.f32 %v166_v13, %v165_v12  ;;  %v895_v12 = vmov 10   ;;  %v896_v13 = vmov 12  }
 0x208   :  { %v168_v15 = vrot.slane %v167_v14, 2 }
 0x20a   :  { %v169_v16 = vadd.f32 %v168_v15, %v167_v14  ;;  %v897_v14 = vmov 13   ;;  %v898_v15 = vmov 15  }
 0x20c   :  { %v170_v17 = vrot.slane %v169_v16, 1 }
 0x20e   :  { %v171_v18 = vadd.f32 %v170_v17, %v169_v16 }
 0x210   :  { %v172_v19 = vmul.f32 0.125, %v171_v18 }
 0x212   :  { %v175_v20 = vadd.f32 1e-05, %v172_v19 }
 0x214   :  { %867 = vrsqrt.f32 %v175_v20 }
 0x21e   :  { %v868_v22 = vpop.eup %867 }
 0x21f   :  { %v177_v23 = vmul.f32 %v868_v22, %v173_v21 }
 0x221   :  { %v181_v24 = vrot.slane %v177_v23, %v972_v46 }
 0x223   :  { %v182_v26 = vmul.f32 %v181_v24, %v163_v10  ;;  %v893_v10 = vmov 9  }
 0x225   :  { %v187_v27 = vadd.f32 %v739_v25, %v182_v26 }
 0x227   :  { %v188_v28 = vmul.f32 0.01, %v187_v27 }
 0x229   :  { %v189_v29 = vmax.f32 %v187_v27, %v188_v28  ;;  %v745_v28 = vld [vmem:[%s1150_s1 + $0x83] ss:$0 sm:$0xff] }
 0x22b   :  { %v196_v30 = vpack.c.bf16 %v189_v29, %v189_v29  ;;  %v749_v29 = vld [vmem:[%s1150_s1 + $0x87] ss:$0 sm:$0xff] }
 0x22d   :  { %812 = vmatmul.mubr.msk.bf16.vlgmr.msra.gmra.mrb[4].mxu0 %vm19_vm1, %v196_v30 }
 0x300   :  { %v234_v33 = vpop.f32.mrb[4].mxu0 }
 0x301   :  { %v241_v34 = vsel %vm240_vm3, %v234_v33, 0.0  ;;  %v813_v35 = vpop.f32.mrb[5].mxu0 }
 0x302   :  { %v242_v36 = vrot.slane %v241_v34, 4  ;;  %v237_v37 = vpop.f32.mrb[6].mxu0  ;;  %v747_v35 = vld [vmem:[%s1150_s1 + $0x85] ss:$0 sm:$0xff] }
 0x303   :  { %v814_v38 = vpop.f32.mrb[7].mxu0  ;;  %v752_v37 = vld [vmem:[%s1150_s1 + $0x8a] ss:$0 sm:$0xff] }
 0x304   :  { %v243_v39 = vadd.f32 %v242_v36, %v241_v34  ;;  %v746_v34 = vld [vmem:[%s1150_s1 + $0x84] ss:$0 sm:$0xff]  ;;  %v748_v36 = vld [vmem:[%s1150_s1 + $0x86] ss:$0 sm:$0xff]  ;;  %v744_v38 = vld [vmem:[%s1150_s1 + $0x82] ss:$0 sm:$0xff] }
 0x306   :  { %v244_v40 = vrot.slane %v243_v39, 2 }
 0x308   :  { %v245_v41 = vadd.f32 %v244_v40, %v243_v39  ;;  %v742_v39 = vld [vmem:[%s1150_s1 + $0x80] ss:$0 sm:$0xff] }
 0x30a   :  { %v246_v42 = vrot.slane %v245_v41, 1 }
 0x30c   :  { %v247_v43 = vadd.f32 %v246_v42, %v245_v41 }
 0x30e   :  { %v248_v44 = vmul.f32 0.125, %v247_v43 }
 0x310   :  { %v249_v45 = vsub.f32 %v234_v33, %v248_v44  ;;  %v743_v33 = vld [vmem:[%s1150_s1 + $0x81] ss:$0 sm:$0xff] }
 0x312   :  { %v250_v47 = vmul.f32 %v249_v45, %v249_v45 }
 0x314   :  { %v251_v48 = vsel %vm240_vm3, %v250_v47, 0.0  ;;  %v753_v47 = vld [vmem:[%s1150_s1 + $0x8b] ss:$0 sm:$0xff] }
 0x315   :  { %v252_v49 = vrot.slane %v251_v48, 4 }
 0x317   :  { %v253_v50 = vadd.f32 %v252_v49, %v251_v48  ;;  %v751_v48 = vld [vmem:[%s1150_s1 + $0x89] ss:$0 sm:$0xff]  ;;  %v755_v49 = vld [vmem:[%s1150_s1 + $0x8d] ss:$0 sm:$0xff] }
 0x319   :  { %v254_v51 = vrot.slane %v253_v50, 2 }
 0x31b   :  { %v255_v52 = vadd.f32 %v254_v51, %v253_v50  ;;  %v750_v51 = vld [vmem:[%s1150_s1 + $0x88] ss:$0 sm:$0xff] }
 0x31d   :  { %v256_v53 = vrot.slane %v255_v52, 1 }
 0x31f   :  { %v257_v54 = vadd.f32 %v256_v53, %v255_v52 }
 0x321   :  { %v258_v55 = vmul.f32 0.125, %v257_v54 }
 0x323   :  { %v261_v56 = vadd.f32 1e-05, %v258_v55  ;;  %v756_v55 = vld [vmem:[%s1150_s1 + $0x8e] ss:$0 sm:$0xff] }
 0x325   :  { %869 = vrsqrt.f32 %v261_v56 }
 0x32f   :  { %v870_v58 = vpop.eup %869 }
 0x330   :  { %v263_v59 = vmul.f32 %v870_v58, %v259_v57  ;;  %v754_v57 = vld [vmem:[%s1150_s1 + $0x8c] ss:$0 sm:$0xff]  ;;  %v757_v58 = vld [vmem:[%s1150_s1 + $0x8f] ss:$0 sm:$0xff] }
 0x332   :  { %v267_v60 = vrot.slane %v263_v59, %v972_v46 }
 0x334   :  { %v268_v62 = vmul.f32 %v267_v60, %v249_v45 }
 0x336   :  { %v273_v63 = vadd.f32 %v741_v61, %v268_v62 }
 0x338   :  { %v274_v1 = vmul.f32 0.01, %v273_v63 }
 0x33a   :  { %v275_v2 = vmax.f32 %v273_v63, %v274_v1 }
 0x33c   :  { %299 = vperm.xlu1 %838, %v275_v2   ;;  %279 = vperm.xlu0 %836, %v275_v2  }
 0x340   :  { %839 = vset.pattern.permute.xlu1 %v885_v3  ;;  %837 = vset.pattern.permute.xlu0 %v886_v4 }
 0x341   :  { %309 = vperm.xlu1 %839, %v275_v2   ;;  %289 = vperm.xlu0 %837, %v275_v2  }
 0x345   :  { %840 = vset.pattern.permute.xlu1 %v887_v5  ;;  %841 = vset.pattern.permute.xlu0 %v888_v6 }
 0x346   :  { %319 = vperm.xlu1 %840, %v275_v2   ;;  %329 = vperm.xlu0 %841, %v275_v2  }
 0x34a   :  { %842 = vset.pattern.permute.xlu1 %v889_v0  ;;  %844 = vset.pattern.permute.xlu0 %v890_v7 }
 0x34b   :  { %339 = vperm.xlu1 %842, %v275_v2   ;;  %359 = vperm.xlu0 %844, %v275_v2  }
 0x34f   :  { %843 = vset.pattern.permute.xlu1 %v891_v8  ;;  %847 = vset.pattern.permute.xlu0 %v892_v9 }
 0x350   :  { %349 = vperm.xlu1 %843, %v275_v2   ;;  %389 = vperm.xlu0 %847, %v275_v2  }
 0x354   :  { %845 = vset.pattern.permute.xlu1 %v893_v10  ;;  %850 = vset.pattern.permute.xlu0 %v894_v11 }
 0x355   :  { %369 = vperm.xlu1 %845, %v275_v2   ;;  %419 = vperm.xlu0 %850, %v275_v2  }
 0x359   :  { %846 = vset.pattern.permute.xlu1 %v895_v12  ;;  %853 = vset.pattern.permute.xlu0 %v886_v4 }
 0x35a   :  { %379 = vperm.xlu1 %846, %v275_v2  }
 0x35e   :  { %848 = vset.pattern.permute.xlu1 %v896_v13 }
 0x35f   :  { %399 = vperm.xlu1 %848, %v275_v2  }
 0x363   :  { %849 = vset.pattern.permute.xlu1 %v897_v14 }
 0x364   :  { %409 = vperm.xlu1 %849, %v275_v2  }
 0x368   :  { %851 = vset.pattern.permute.xlu1 %v898_v15 }
 0x369   :  { %429 = vperm.xlu1 %851, %v275_v2  }
 0x36d   :  { %852 = vset.pattern.permute.xlu1 %v884_v32 }
 0x3bb   :  { %v300_v16 = vpop.permute.xlu1 %299  ;;  %v280_v19 = vpop.permute.xlu0 %279 }
 0x3bc   :  { %v306_v53 = vmul.f32 %v744_v38, %v300_v16  ;;  %v286_v54 = vmul.f32 %v742_v39, %v280_v19 }
 0x3c0   :  { %v310_v17 = vpop.permute.xlu1 %309  ;;  %v290_v21 = vpop.permute.xlu0 %289 }
 0x3c1   :  { %v316_v42 = vmul.f32 %v745_v28, %v310_v17  ;;  %v296_v43 = vmul.f32 %v743_v33, %v290_v21 }
 0x3c3   :  { %v438_v63 = vadd.f32 %v316_v42, %v306_v53  ;;  %v437_v1 = vadd.f32 %v296_v43, %v286_v54 }
 0x3c5   :  { %v320_v18 = vpop.permute.xlu1 %319  ;;  %v330_v23 = vpop.permute.xlu0 %329 }
 0x3c6   :  { %v326_v44 = vmul.f32 %v746_v34, %v320_v18  ;;  %v336_v45 = vmul.f32 %v747_v35, %v330_v23  ;;  %v445_v18 = vadd.f32 %v438_v63, %v437_v1  ;;  %v765_v1 = vld [vmem:[%s1150_s1 + $0x96] ss:$0 sm:$0xff] }
 0x3c8   :  { %v439_v2 = vadd.f32 %v336_v45, %v326_v44  ;;  %v471_v45 = vld [vmem:[%s1150_s1 + $0xa1] sm:$0x1] }
 0x3ca   :  { %v340_v20 = vpop.permute.xlu1 %339  ;;  %v360_v26 = vpop.permute.xlu0 %359 }
 0x3cb   :  { %v346_v50 = vmul.f32 %v748_v36, %v340_v20  ;;  %v366_v7 = vmul.f32 %v750_v51, %v360_v26 }
 0x3cf   :  { %v350_v22 = vpop.permute.xlu1 %349  ;;  %v390_v30 = vpop.permute.xlu0 %389 }
 0x3d0   :  { %v356_v40 = vmul.f32 %v749_v29, %v350_v22  ;;  %v396_v60 = vmul.f32 %v753_v47, %v390_v30 }
 0x3d2   :  { %v440_v59 = vadd.f32 %v356_v40, %v346_v50  ;;  %v758_v50 = vld [vmem:[%s1150_s1 + $0xa7] ss:$0 sm:$0xff] }
 0x3d4   :  { %v370_v24 = vpop.permute.xlu1 %369  ;;  %v420_v56 = vpop.permute.xlu0 %419  ;;  %v446_v14 = vadd.f32 %v440_v59, %v439_v2  ;;  %v764_v59 = vld [vmem:[%s1150_s1 + $0x95] ss:$0 sm:$0xff] }
 0x3d5   :  { %v376_v61 = vmul.f32 %v751_v48, %v370_v24  ;;  %v426_v10 = vmul.f32 %v756_v55, %v420_v56 }
 0x3d6   :  { %v449_v21 = vadd.f32 %v446_v14, %v445_v18 }
 0x3d7   :  { %v441_v15 = vadd.f32 %v376_v61, %v366_v7  ;;  %v763_v61 = vld [vmem:[%s1150_s1 + $0x94] ss:$0 sm:$0xff] }
 0x3d9   :  { %v380_v25 = vpop.permute.xlu1 %379 }
 0x3da   :  { %v386_v52 = vmul.f32 %v752_v37, %v380_v25 }
 0x3dc   :  { %v442_v11 = vadd.f32 %v396_v60, %v386_v52 }
 0x3de   :  { %v400_v27 = vpop.permute.xlu1 %399  ;;  %v447_v19 = vadd.f32 %v442_v11, %v441_v15 }
 0x3df   :  { %v406_v12 = vmul.f32 %v754_v57, %v400_v27 }
 0x3e3   :  { %v410_v41 = vpop.permute.xlu1 %409 }
 0x3e4   :  { %v416_v62 = vmul.f32 %v755_v49, %v410_v41 }
 0x3e6   :  { %v443_v16 = vadd.f32 %v416_v62, %v406_v12  ;;  %v766_v62 = vld [vmem:[%s1150_s1 + $0x97] ss:$0 sm:$0xff] }
 0x3e8   :  { %v430_v9 = vpop.permute.xlu1 %429 }
 0x3e9   :  { %v436_v13 = vmul.f32 %v757_v58, %v430_v9 }
 0x3eb   :  { %v444_v17 = vadd.f32 %v436_v13, %v426_v10 }
 0x3ed   :  { %v448_v20 = vadd.f32 %v444_v17, %v443_v16 }
 0x3ef   :  { %v450_v22 = vadd.f32 %v448_v20, %v447_v19 }
 0x3f1   :  { %v451_v23 = vadd.f32 %v450_v22, %v449_v21 }
 0x3f3   :  { %v453_v24 = vsel %vm452_vm4, %v451_v23, 0.0 }
 0x3f4   :  { %v454_v25 = vrot.slane %v453_v24, 4 }
 0x3f6   :  { %v455_v28 = vadd.f32 %v454_v25, %v453_v24 }
 0x3f8   :  { %v456_v26 = vrot.slane %v455_v28, 2 }
 0x3fa   :  { %v457_v29 = vadd.f32 %v456_v26, %v455_v28 }
 0x3fc   :  { %v458_v30 = vrot.slane %v457_v29, 1 }
 0x3fe   :  { %v459_v33 = vadd.f32 %v458_v30, %v457_v29 }
 0x400   :  { %v460_v27 = vmul.f32 0.125, %v459_v33 }
 0x402   :  { %v461_v34 = vsub.f32 %v451_v23, %v460_v27 }
 0x404   :  { %v462_v35 = vmul.f32 %v461_v34, %v461_v34 }
 0x406   :  { %v463_v36 = vsel %vm452_vm4, %v462_v35, 0.0 }
 0x407   :  { %v464_v37 = vrot.slane %v463_v36, 4 }
 0x409   :  { %v465_v38 = vadd.f32 %v464_v37, %v463_v36 }
 0x40b   :  { %v466_v39 = vrot.slane %v465_v38, 2 }
 0x40d   :  { %v467_v40 = vadd.f32 %v466_v39, %v465_v38 }
 0x40f   :  { %v468_v41 = vrot.slane %v467_v40, 1 }
 0x411   :  { %v469_v42 = vadd.f32 %v468_v41, %v467_v40 }
 0x413   :  { %v470_v43 = vmul.f32 0.125, %v469_v42 }
 0x415   :  { %v473_v44 = vadd.f32 1e-05, %v470_v43  ;;  %v595_v43 = vld [vmem:[%s1150_s1 + $0xa2] sm:$0x1] }
 0x417   :  { %871 = vrsqrt.f32 %v473_v44 }
 0x421   :  { %v872_v47 = vpop.eup %871 }
 0x422   :  { %v475_v48 = vmul.f32 %v872_v47, %v471_v45 }
 0x424   :  { %v479_v49 = vrot.slane %v475_v48, %v972_v46  ;;  %v767_v48 = vld [vmem:[%s1150_s1 + $0xa8] ss:$0 sm:$0xff] }
 0x426   :  { %v480_v51 = vmul.f32 %v479_v49, %v461_v34 }
 0x428   :  { %v485_v52 = vadd.f32 %v758_v50, %v480_v51 }
 0x42a   :  { %v486_v53 = vmul.f32 0.01, %v485_v52 }
 0x42c   :  { %v487_v54 = vmax.f32 %v485_v52, %v486_v53  ;;  %v774_v53 = vld [vmem:[%s1150_s1 + $0x9d] ss:$0 sm:$0xff] }
 0x42e   :  { %501 = vperm.xlu0 %853, %v487_v54   ;;  %491 = vperm.xlu1 %852, %v487_v54  }
 0x432   :  { %856 = vset.pattern.permute.xlu0 %v887_v5  ;;  %854 = vset.pattern.permute.xlu1 %v883_v31 }
 0x433   :  { %531 = vperm.xlu0 %856, %v487_v54   ;;  %511 = vperm.xlu1 %854, %v487_v54  }
 0x437   :  { %859 = vset.pattern.permute.xlu0 %v891_v8  ;;  %855 = vset.pattern.permute.xlu1 %v885_v3  ;;  %v762_v8 = vld [vmem:[%s1150_s1 + $0x93] ss:$0 sm:$0xff] }
 0x438   :  { %561 = vperm.xlu0 %859, %v487_v54   ;;  %521 = vperm.xlu1 %855, %v487_v54  }
 0x43c   :  { %857 = vset.pattern.permute.xlu1 %v888_v6  ;;  %862 = vset.pattern.permute.xlu0 %v883_v31  ;;  %v760_v6 = vld [vmem:[%s1150_s1 + $0x91] ss:$0 sm:$0xff] }
 0x43d   :  { %541 = vperm.xlu1 %857, %v487_v54  }
 0x441   :  { %858 = vset.pattern.permute.xlu1 %v889_v0  ;;  %v759_v0 = vld [vmem:[%s1150_s1 + $0x90] ss:$0 sm:$0xff] }
 0x442   :  { %551 = vperm.xlu1 %858, %v487_v54  }
 0x446   :  { %860 = vset.pattern.permute.xlu1 %v884_v32  ;;  %v761_v32 = vld [vmem:[%s1150_s1 + $0x92] ss:$0 sm:$0xff] }
 0x4ad   :  { %v492_v5 = vpop.permute.xlu1 %491  ;;  %v502_v56 = vpop.permute.xlu0 %501 }
 0x4ae   :  { %v508_v2 = vmul.f32 %v760_v6, %v502_v56  ;;  %v498_v7 = vmul.f32 %v759_v0, %v492_v5 }
 0x4b0   :  { %v569_v16 = vadd.f32 %v508_v2, %v498_v7 }
 0x4b2   :  { %v512_v55 = vpop.permute.xlu1 %511  ;;  %v532_v58 = vpop.permute.xlu0 %531 }
 0x4b3   :  { %v518_v9 = vmul.f32 %v761_v32, %v512_v55  ;;  %v538_v12 = vmul.f32 %v763_v61, %v532_v58  ;;  %v769_v55 = vld [vmem:[%s1150_s1 + $0x99] ss:$0 sm:$0xff] }
 0x4b7   :  { %v522_v57 = vpop.permute.xlu1 %521  ;;  %v562_v63 = vpop.permute.xlu0 %561 }
 0x4b8   :  { %v528_v60 = vmul.f32 %v762_v8, %v522_v57  ;;  %v568_v13 = vmul.f32 %v766_v62, %v562_v63  ;;  %v771_v57 = vld [vmem:[%s1150_s1 + $0x9b] ss:$0 sm:$0xff] }
 0x4ba   :  { %v570_v14 = vadd.f32 %v528_v60, %v518_v9 }
 0x4bc   :  { %v542_v31 = vpop.permute.xlu1 %541  ;;  %v573_v19 = vadd.f32 %v570_v14, %v569_v16 }
 0x4bd   :  { %v548_v10 = vmul.f32 %v764_v59, %v542_v31 }
 0x4bf   :  { %v571_v17 = vadd.f32 %v548_v10, %v538_v12 }
 0x4c1   :  { %v552_v11 = vpop.permute.xlu1 %551 }
 0x4c2   :  { %v558_v15 = vmul.f32 %v765_v1, %v552_v11 }
 0x4c4   :  { %v572_v18 = vadd.f32 %v568_v13, %v558_v15 }
 0x4c6   :  { %v574_v20 = vadd.f32 %v572_v18, %v571_v17 }
 0x4c8   :  { %v575_v21 = vadd.f32 %v574_v20, %v573_v19 }
 0x4ca   :  { %v577_v22 = vsel %vm576_vm5, %v575_v21, 0.0 }
 0x4cb   :  { %v578_v23 = vrot.slane %v577_v22, 4 }
 0x4cd   :  { %v579_v24 = vadd.f32 %v578_v23, %v577_v22  ;;  %v675_v22 = vld [vmem:[%s1150_s1 + $0xa3] sm:$0x1] }
 0x4cf   :  { %v580_v25 = vrot.slane %v579_v24, 2 }
 0x4d1   :  { %v581_v28 = vadd.f32 %v580_v25, %v579_v24 }
 0x4d3   :  { %v582_v26 = vrot.slane %v581_v28, 1 }
 0x4d5   :  { %v583_v29 = vadd.f32 %v582_v26, %v581_v28  ;;  %v772_v28 = vld [vmem:[%s1150_s1 + $0xa9] ss:$0 sm:$0xff] }
 0x4d7   :  { %v584_v30 = vmul.f32 0.125, %v583_v29 }
 0x4d9   :  { %v585_v33 = vsub.f32 %v575_v21, %v584_v30 }
 0x4db   :  { %v586_v27 = vmul.f32 %v585_v33, %v585_v33 }
 0x4dd   :  { %v587_v34 = vsel %vm576_vm5, %v586_v27, 0.0 }
 0x4de   :  { %v588_v35 = vrot.slane %v587_v34, 4 }
 0x4e0   :  { %v589_v36 = vadd.f32 %v588_v35, %v587_v34  ;;  %v773_v35 = vld [vmem:[%s1150_s1 + $0x9c] ss:$0 sm:$0xff] }
 0x4e2   :  { %v590_v37 = vrot.slane %v589_v36, 2 }
 0x4e4   :  { %v591_v38 = vadd.f32 %v590_v37, %v589_v36 }
 0x4e6   :  { %v592_v39 = vrot.slane %v591_v38, 1 }
 0x4e8   :  { %v593_v40 = vadd.f32 %v592_v39, %v591_v38 }
 0x4ea   :  { %v594_v41 = vmul.f32 0.125, %v593_v40 }
 0x4ec   :  { %v597_v42 = vadd.f32 1e-05, %v594_v41 }
 0x4ee   :  { %873 = vrsqrt.f32 %v597_v42 }
 0x4f8   :  { %v874_v44 = vpop.eup %873 }
 0x4f9   :  { %v599_v45 = vmul.f32 %v874_v44, %v595_v43 }
 0x4fb   :  { %v603_v47 = vrot.slane %v599_v45, %v972_v46 }
 0x4fd   :  { %v604_v49 = vmul.f32 %v603_v47, %v585_v33 }
 0x4ff   :  { %v609_v50 = vadd.f32 %v767_v48, %v604_v49 }
 0x501   :  { %v610_v51 = vmul.f32 0.01, %v609_v50 }
 0x503   :  { %v611_v52 = vmax.f32 %v609_v50, %v610_v51 }
 0x505   :  { %635 = vperm.xlu0 %862, %v611_v52   ;;  %615 = vperm.xlu1 %860, %v611_v52  }
 0x509   :  { %861 = vset.pattern.permute.xlu1 %v886_v4  ;;  %864 = vset.pattern.permute.xlu0 %v885_v3  ;;  %v770_v4 = vld [vmem:[%s1150_s1 + $0x9a] ss:$0 sm:$0xff] }
 0x50a   :  { %625 = vperm.xlu1 %861, %v611_v52  }
 0x50e   :  { %863 = vset.pattern.permute.xlu1 %v885_v3  ;;  %v768_v3 = vld [vmem:[%s1150_s1 + $0x98] ss:$0 sm:$0xff] }
 0x50f   :  { %645 = vperm.xlu1 %863, %v611_v52  }
 0x513   :  { %705 = vrot.lane.b32.xlu1 %v774_v53, %s899_s25 }
 0x584   :  { %v616_v54 = vpop.permute.xlu1 %615  ;;  %v636_v56 = vpop.permute.xlu0 %635 }
 0x585   :  { %v642_v6 = vmul.f32 %v770_v4, %v636_v56  ;;  %v622_v31 = vmul.f32 %v768_v3, %v616_v54 }
 0x589   :  { %v626_v5 = vpop.permute.xlu1 %625 }
 0x58a   :  { %v632_v58 = vmul.f32 %v769_v55, %v626_v5 }
 0x58c   :  { %v653_v32 = vadd.f32 %v632_v58, %v622_v31 }
 0x58e   :  { %v646_v8 = vpop.permute.xlu1 %645 }
 0x58f   :  { %v652_v0 = vmul.f32 %v771_v57, %v646_v8 }
 0x591   :  { %v654_v59 = vadd.f32 %v652_v0, %v642_v6 }
 0x592   :  { %v706_v33 = vpop.permute.xlu1 %705 }
 0x593   :  { %v655_v60 = vadd.f32 %v654_v59, %v653_v32 }
 0x595   :  { %v657_v61 = vsel %vm656_vm6, %v655_v60, 0.0 }
 0x596   :  { %v658_v62 = vrot.slane %v657_v61, 4 }
 0x598   :  { %v659_v63 = vadd.f32 %v658_v62, %v657_v61 }
 0x59a   :  { %v660_v1 = vrot.slane %v659_v63, 2 }
 0x59c   :  { %v661_v2 = vadd.f32 %v660_v1, %v659_v63 }
 0x59e   :  { %v662_v7 = vrot.slane %v661_v2, 1 }
 0x5a0   :  { %v663_v9 = vadd.f32 %v662_v7, %v661_v2 }
 0x5a2   :  { %v664_v10 = vmul.f32 0.125, %v663_v9 }
 0x5a4   :  { %v665_v11 = vsub.f32 %v655_v60, %v664_v10 }
 0x5a6   :  { %v666_v12 = vmul.f32 %v665_v11, %v665_v11 }
 0x5a8   :  { %v667_v13 = vsel %vm656_vm6, %v666_v12, 0.0 }
 0x5a9   :  { %v668_v14 = vrot.slane %v667_v13, 4 }
 0x5ab   :  { %v669_v15 = vadd.f32 %v668_v14, %v667_v13 }
 0x5ad   :  { %v670_v16 = vrot.slane %v669_v15, 2 }
 0x5af   :  { %v671_v17 = vadd.f32 %v670_v16, %v669_v15 }
 0x5b1   :  { %v672_v18 = vrot.slane %v671_v17, 1 }
 0x5b3   :  { %v673_v19 = vadd.f32 %v672_v18, %v671_v17 }
 0x5b5   :  { %v674_v20 = vmul.f32 0.125, %v673_v19 }
 0x5b7   :  { %v677_v21 = vadd.f32 1e-05, %v674_v20 }
 0x5b9   :  { %875 = vrsqrt.f32 %v677_v21 }
 0x5c3   :  { %v876_v23 = vpop.eup %875 }
 0x5c4   :  { %v679_v24 = vmul.f32 %v876_v23, %v675_v22 }
 0x5c6   :  { %v683_v25 = vrot.slane %v679_v24, %v972_v46  ;;  %v775_v46 = vld [vmem:[%s1150_s1 + $0xaa] ss:$0 sm:$0xff] }
 0x5c8   :  { %v684_v26 = vmul.f32 %v683_v25, %v665_v11 }
 0x5ca   :  { %v689_v29 = vadd.f32 %v772_v28, %v684_v26 }
 0x5cc   :  { %v690_v30 = vmul.f32 0.01, %v689_v29 }
 0x5ce   :  { %v691_v27 = vmax.f32 %v689_v29, %v690_v30 }
 0x5d0   :  { %v708_v34 = vmul.f32 %v706_v33, %v691_v27  ;;  %v698_v36 = vmul.f32 %v773_v35, %v691_v27 }
 0x5d2   :  { %710 = vrot.lane.b32.xlu0 %v708_v34, %s900_s10 }
 0x644   :  { %v711_v37 = vpop.permute.xlu0 %710 }
 0x645   :  { %v713_v38 = vadd.f32 %v711_v37, %v698_v36 }
 0x647   :  { %v718_v39 = vadd.f32 %v775_v46, %v713_v38 }
 0x649   :  { %v719_v40 = vsub.f32 0.0, %v718_v39 }
 0x64b   :  { %v720_v41 = vmul.f32 1.442695, %v719_v40 }
 0x64d   :  { %877 = vpow2.f32 %v720_v41 }
 0x657   :  { %v878_v42 = vpop.eup %877 }
 0x658   :  { %v722_v43 = vadd.f32 1.0, %v878_v42 }
 0x65a   :  { %879 = vrcp.f32 %v722_v43 }
 0x664   :  { %v880_v44 = vpop.eup %879 }
 0x665   :  { %725 = vrot.lane.b32.xlu1 %v880_v44, %s901_s15 }
 0x6d7   :  { %v726_v45 = vpop.permute.xlu1 %725 }
 0x6d8   :  { %v728_v47 = vsel %vm656_vm6, %v691_v27, %v726_v45 }
 0x6d9   :  { %v730_v48 = vsel %vm729_vm7, %v728_v47, 0.0 }
 0x6da   :  { %731 = vst [vmem:[%s1152_s2] sm:$0xff] %v730_v48 }

</bundles_post_ra>
